<compile_context>
chip_gen: v7x
topology: tpu7x:2x2x1
jax: 0.10.0
libtpu: 0.0.40
codegen_flags: <defaults>
</compile_context>

<pallas_src>
import math

import jax
import jax.numpy as jnp
from jax.experimental import pallas as pl
from jax.experimental.pallas import tpu as pltpu

_F_PAD = 8  # input features padded 5 -> 8 (sublane alignment)


def _mlp_kernel(x_ref, w1_ref, b1_ref, w2_ref, b2_ref, w3_ref, b3_ref, o_ref):
    """Fused fc1->ReLU->fc2->ReLU->fc3->sigmoid on a (features, batch_tile) block.

    All layers computed as unrolled VPU broadcast-FMAs (no MXU); batch on lanes.
    """
    x = x_ref[...]                      # (K0=8, TB) f32, rows 5..7 are zero padding
    tb = x.shape[1]

    def dense(w, b, a):
        # w: (N, K), b: (N, 1), a: (K, TB)  ->  (N, TB)
        n, k = w.shape
        acc = jnp.broadcast_to(b, (n, tb))          # bias, broadcast along lanes
        for kk in range(k):                          # static unroll, K <= 16
            acc = acc + w[:, kk:kk + 1] * a[kk:kk + 1, :]
        return acc

    h1 = jnp.maximum(dense(w1_ref[...], b1_ref[...], x), 0.0)     # (16, TB)
    h2 = jnp.maximum(dense(w2_ref[...], b2_ref[...], h1), 0.0)    # (8, TB)
    o_ref[...] = jax.nn.sigmoid(dense(w3_ref[...], b3_ref[...], h2))  # (1, TB)


def _round_up(n, m):
    return ((n + m - 1) // m) * m


def drowsiness_forward(x, params, tile_b=512):
    """x: (B, 5) f32.  params: (w1,b1,w2,b2,w3,b3) with w stored (in, out)."""
    w1, b1, w2, b2, w3, b3 = params
    B, F = x.shape
    assert F == w1.shape[0]

    # Batch tile: multiple of 128 lanes; pad batch up to a multiple of the tile.
    tile_b = max(128, (tile_b // 128) * 128)
    tb = min(tile_b, _round_up(B, 128))
    Bp = _round_up(B, tb)
    grid = (pl.cdiv(Bp, tb),)

    # Wrapper-side layout plumbing (pure XLA, cheap): feature-major, lane-dense.
    xt = jnp.pad(x.astype(jnp.float32), ((0, Bp - B), (0, _F_PAD - F))).T  # (8, Bp)
    w1t = jnp.pad(w1.astype(jnp.float32), ((0, _F_PAD - F), (0, 0))).T     # (16, 8)
    w2t = w2.astype(jnp.float32).T                                         # (8, 16)
    w3t = w3.astype(jnp.float32).T                                         # (1, 8)
    b1c = b1.astype(jnp.float32).reshape(16, 1)
    b2c = b2.astype(jnp.float32).reshape(8, 1)
    b3c = b3.astype(jnp.float32).reshape(1, 1)

    param_bytes = 4 * (w1t.size + w2t.size + w3t.size + b1c.size + b2c.size + b3c.size)
    cost = pl.CostEstimate(
        flops=2 * B * (5 * 16 + 16 * 8 + 8 * 1),
        transcendentals=B,
        bytes_accessed=4 * (xt.size + Bp) + param_bytes,
    )

    out = pl.pallas_call(
        _mlp_kernel,
        out_shape=jax.ShapeDtypeStruct((1, Bp), jnp.float32),
        grid_spec=pltpu.PrefetchScalarGridSpec(
            num_scalar_prefetch=0,
            grid=grid,
            in_specs=[
                pl.BlockSpec((_F_PAD, tb), lambda i: (0, i)),   # x tile (batch on lanes)
                pl.BlockSpec((16, _F_PAD), lambda i: (0, 0)),   # w1^T  (VMEM-resident)
                pl.BlockSpec((16, 1), lambda i: (0, 0)),        # b1
                pl.BlockSpec((8, 16), lambda i: (0, 0)),        # w2^T
                pl.BlockSpec((8, 1), lambda i: (0, 0)),         # b2
                pl.BlockSpec((1, _F_PAD), lambda i: (0, 0)),    # w3^T
                pl.BlockSpec((1, 1), lambda i: (0, 0)),         # b3
            ],
            out_specs=pl.BlockSpec((1, tb), lambda i: (0, i)),  # lane-dense output
        ),
        compiler_params=pltpu.CompilerParams(
            dimension_semantics=("parallel",),
            vmem_limit_bytes=32 * 1024 * 1024,
        ),
        cost_estimate=cost,
    )(xt, w1t, b1c, w2t, b2c, w3t, b3c)

    return out[0, :B].reshape(B, 1)


def init_params(key, input_size=5):
    """PyTorch nn.Linear default init: U(-1/sqrt(fan_in), 1/sqrt(fan_in))."""
    dims = [(input_size, 16), (16, 8), (8, 1)]
    params = []
    for fan_in, fan_out in dims:
        key, kw, kb = jax.random.split(key, 3)
        bound = 1.0 / math.sqrt(fan_in)
        w = jax.random.uniform(kw, (fan_in, fan_out), jnp.float32, -bound, bound)
        b = jax.random.uniform(kb, (fan_out,), jnp.float32, -bound, bound)
        params.extend([w, b])
    return tuple(params)


def reference_forward(x, params):
    w1, b1, w2, b2, w3, b3 = params
    h1 = jnp.maximum(x @ w1 + b1, 0.0)
    h2 = jnp.maximum(h1 @ w2 + b2, 0.0)
    return jax.nn.sigmoid(h2 @ w3 + b3)


if __name__ == "__main__":
    key = jax.random.PRNGKey(0)
    key, kx1, kx2 = jax.random.split(key, 3)
    params = init_params(key, input_size=5)

    # Small nominal batch (single grid step).
    x_small = jax.random.normal(kx1, (8, 5), jnp.float32)
    out_small = jax.block_until_ready(drowsiness_forward(x_small, params))
    ref_small = reference_forward(x_small, params)
    assert out_small.shape == (8, 1)
    assert jnp.allclose(out_small, ref_small, atol=1e-5, rtol=1e-5), "mismatch (B=8)"

    # Larger, non-tile-aligned batch to exercise the batch grid + tail padding.
    x_big = jax.random.normal(kx2, (300, 5), jnp.float32)
    out_big = jax.block_until_ready(drowsiness_forward(x_big, params, tile_b=128))
    ref_big = reference_forward(x_big, params)
    assert out_big.shape == (300, 1)
    assert jnp.allclose(out_big, ref_big, atol=1e-5, rtol=1e-5), "mismatch (B=300)"

    print("KERNEL_OK")
</pallas_src>

<mosaic_0001>
module attributes {stable_mosaic.version = 11 : i64} {
  func.func @_mlp_kernel(%arg0: i32, %arg1: memref<8x128xf32, #tpu.memory_space<vmem>>, %arg2: memref<16x8xf32, #tpu.memory_space<vmem>>, %arg3: memref<16x1xf32, #tpu.memory_space<vmem>>, %arg4: memref<8x16xf32, #tpu.memory_space<vmem>>, %arg5: memref<8x1xf32, #tpu.memory_space<vmem>>, %arg6: memref<1x8xf32, #tpu.memory_space<vmem>>, %arg7: memref<1x1xf32, #tpu.memory_space<vmem>>, %arg8: memref<1x128xf32, #tpu.memory_space<vmem>>) attributes {dimension_semantics = [#tpu.dimension_semantics<parallel>], iteration_bounds = array<i64: 1>, scalar_prefetch = 0 : i64, scratch_operands = 0 : i64, tpu.core_type = #tpu.core_type<tc>, window_params = [{transform_indices = @transform_0, window_bounds = array<i64: 8, 128>}, {pipeline_mode = #tpu.pipeline_mode<synchronous>, transform_indices = @transform_1, window_bounds = array<i64: 16, 8>}, {pipeline_mode = #tpu.pipeline_mode<synchronous>, transform_indices = @transform_2, window_bounds = array<i64: 16, 1>}, {pipeline_mode = #tpu.pipeline_mode<synchronous>, transform_indices = @transform_3, window_bounds = array<i64: 8, 16>}, {pipeline_mode = #tpu.pipeline_mode<synchronous>, transform_indices = @transform_4, window_bounds = array<i64: 8, 1>}, {pipeline_mode = #tpu.pipeline_mode<synchronous>, transform_indices = @transform_5, window_bounds = array<i64: 1, 8>}, {pipeline_mode = #tpu.pipeline_mode<synchronous>, transform_indices = @transform_6, window_bounds = array<i64: 1, 1>}, {transform_indices = @transform_7, window_bounds = array<i64: 1, 128>}]} {
    %c0 = arith.constant 0 : index
    %c0_0 = arith.constant 0 : index
    %0 = vector.load %arg1[%c0, %c0_0] : memref<8x128xf32, #tpu.memory_space<vmem>>, vector<8x128xf32>
    %c0_1 = arith.constant 0 : index
    %c0_2 = arith.constant 0 : index
    %1 = vector.load %arg2[%c0_1, %c0_2] : memref<16x8xf32, #tpu.memory_space<vmem>>, vector<16x8xf32>
    %c0_3 = arith.constant 0 : index
    %c0_4 = arith.constant 0 : index
    %2 = vector.load %arg3[%c0_3, %c0_4] : memref<16x1xf32, #tpu.memory_space<vmem>>, vector<16x1xf32>
    %3 = vector.shape_cast %2 : vector<16x1xf32> to vector<16x1xf32>
    %4 = vector.broadcast %3 : vector<16x1xf32> to vector<16x128xf32>
    %5 = vector.extract_strided_slice %1 {offsets = [0, 0], sizes = [16, 1], strides = [1, 1]} : vector<16x8xf32> to vector<16x1xf32>
    %6 = vector.extract_strided_slice %0 {offsets = [0, 0], sizes = [1, 128], strides = [1, 1]} : vector<8x128xf32> to vector<1x128xf32>
    %7 = vector.broadcast %5 : vector<16x1xf32> to vector<16x128xf32>
    %8 = vector.broadcast %6 : vector<1x128xf32> to vector<16x128xf32>
    %9 = arith.mulf %7, %8 : vector<16x128xf32>
    %10 = arith.addf %4, %9 : vector<16x128xf32>
    %11 = vector.extract_strided_slice %1 {offsets = [0, 1], sizes = [16, 1], strides = [1, 1]} : vector<16x8xf32> to vector<16x1xf32>
    %12 = vector.extract_strided_slice %0 {offsets = [1, 0], sizes = [1, 128], strides = [1, 1]} : vector<8x128xf32> to vector<1x128xf32>
    %13 = vector.broadcast %11 : vector<16x1xf32> to vector<16x128xf32>
    %14 = vector.broadcast %12 : vector<1x128xf32> to vector<16x128xf32>
    %15 = arith.mulf %13, %14 : vector<16x128xf32>
    %16 = arith.addf %10, %15 : vector<16x128xf32>
    %17 = vector.extract_strided_slice %1 {offsets = [0, 2], sizes = [16, 1], strides = [1, 1]} : vector<16x8xf32> to vector<16x1xf32>
    %18 = vector.extract_strided_slice %0 {offsets = [2, 0], sizes = [1, 128], strides = [1, 1]} : vector<8x128xf32> to vector<1x128xf32>
    %19 = vector.broadcast %17 : vector<16x1xf32> to vector<16x128xf32>
    %20 = vector.broadcast %18 : vector<1x128xf32> to vector<16x128xf32>
    %21 = arith.mulf %19, %20 : vector<16x128xf32>
    %22 = arith.addf %16, %21 : vector<16x128xf32>
    %23 = vector.extract_strided_slice %1 {offsets = [0, 3], sizes = [16, 1], strides = [1, 1]} : vector<16x8xf32> to vector<16x1xf32>
    %24 = vector.extract_strided_slice %0 {offsets = [3, 0], sizes = [1, 128], strides = [1, 1]} : vector<8x128xf32> to vector<1x128xf32>
    %25 = vector.broadcast %23 : vector<16x1xf32> to vector<16x128xf32>
    %26 = vector.broadcast %24 : vector<1x128xf32> to vector<16x128xf32>
    %27 = arith.mulf %25, %26 : vector<16x128xf32>
    %28 = arith.addf %22, %27 : vector<16x128xf32>
    %29 = vector.extract_strided_slice %1 {offsets = [0, 4], sizes = [16, 1], strides = [1, 1]} : vector<16x8xf32> to vector<16x1xf32>
    %30 = vector.extract_strided_slice %0 {offsets = [4, 0], sizes = [1, 128], strides = [1, 1]} : vector<8x128xf32> to vector<1x128xf32>
    %31 = vector.broadcast %29 : vector<16x1xf32> to vector<16x128xf32>
    %32 = vector.broadcast %30 : vector<1x128xf32> to vector<16x128xf32>
    %33 = arith.mulf %31, %32 : vector<16x128xf32>
    %34 = arith.addf %28, %33 : vector<16x128xf32>
    %35 = vector.extract_strided_slice %1 {offsets = [0, 5], sizes = [16, 1], strides = [1, 1]} : vector<16x8xf32> to vector<16x1xf32>
    %36 = vector.extract_strided_slice %0 {offsets = [5, 0], sizes = [1, 128], strides = [1, 1]} : vector<8x128xf32> to vector<1x128xf32>
    %37 = vector.broadcast %35 : vector<16x1xf32> to vector<16x128xf32>
    %38 = vector.broadcast %36 : vector<1x128xf32> to vector<16x128xf32>
    %39 = arith.mulf %37, %38 : vector<16x128xf32>
    %40 = arith.addf %34, %39 : vector<16x128xf32>
    %41 = vector.extract_strided_slice %1 {offsets = [0, 6], sizes = [16, 1], strides = [1, 1]} : vector<16x8xf32> to vector<16x1xf32>
    %42 = vector.extract_strided_slice %0 {offsets = [6, 0], sizes = [1, 128], strides = [1, 1]} : vector<8x128xf32> to vector<1x128xf32>
    %43 = vector.broadcast %41 : vector<16x1xf32> to vector<16x128xf32>
    %44 = vector.broadcast %42 : vector<1x128xf32> to vector<16x128xf32>
    %45 = arith.mulf %43, %44 : vector<16x128xf32>
    %46 = arith.addf %40, %45 : vector<16x128xf32>
    %47 = vector.extract_strided_slice %1 {offsets = [0, 7], sizes = [16, 1], strides = [1, 1]} : vector<16x8xf32> to vector<16x1xf32>
    %48 = vector.extract_strided_slice %0 {offsets = [7, 0], sizes = [1, 128], strides = [1, 1]} : vector<8x128xf32> to vector<1x128xf32>
    %49 = vector.broadcast %47 : vector<16x1xf32> to vector<16x128xf32>
    %50 = vector.broadcast %48 : vector<1x128xf32> to vector<16x128xf32>
    %51 = arith.mulf %49, %50 : vector<16x128xf32>
    %52 = arith.addf %46, %51 : vector<16x128xf32>
    %cst = arith.constant 0.000000e+00 : f32
    %53 = vector.broadcast %cst : f32 to vector<16x128xf32>
    %54 = arith.maximumf %52, %53 : vector<16x128xf32>
    %c0_5 = arith.constant 0 : index
    %c0_6 = arith.constant 0 : index
    %55 = vector.load %arg4[%c0_5, %c0_6] : memref<8x16xf32, #tpu.memory_space<vmem>>, vector<8x16xf32>
    %c0_7 = arith.constant 0 : index
    %c0_8 = arith.constant 0 : index
    %56 = vector.load %arg5[%c0_7, %c0_8] : memref<8x1xf32, #tpu.memory_space<vmem>>, vector<8x1xf32>
    %57 = vector.shape_cast %56 : vector<8x1xf32> to vector<8x1xf32>
    %58 = vector.broadcast %57 : vector<8x1xf32> to vector<8x128xf32>
    %59 = vector.extract_strided_slice %55 {offsets = [0, 0], sizes = [8, 1], strides = [1, 1]} : vector<8x16xf32> to vector<8x1xf32>
    %60 = vector.extract_strided_slice %54 {offsets = [0, 0], sizes = [1, 128], strides = [1, 1]} : vector<16x128xf32> to vector<1x128xf32>
    %61 = vector.broadcast %59 : vector<8x1xf32> to vector<8x128xf32>
    %62 = vector.broadcast %60 : vector<1x128xf32> to vector<8x128xf32>
    %63 = arith.mulf %61, %62 : vector<8x128xf32>
    %64 = arith.addf %58, %63 : vector<8x128xf32>
    %65 = vector.extract_strided_slice %55 {offsets = [0, 1], sizes = [8, 1], strides = [1, 1]} : vector<8x16xf32> to vector<8x1xf32>
    %66 = vector.extract_strided_slice %54 {offsets = [1, 0], sizes = [1, 128], strides = [1, 1]} : vector<16x128xf32> to vector<1x128xf32>
    %67 = vector.broadcast %65 : vector<8x1xf32> to vector<8x128xf32>
    %68 = vector.broadcast %66 : vector<1x128xf32> to vector<8x128xf32>
    %69 = arith.mulf %67, %68 : vector<8x128xf32>
    %70 = arith.addf %64, %69 : vector<8x128xf32>
    %71 = vector.extract_strided_slice %55 {offsets = [0, 2], sizes = [8, 1], strides = [1, 1]} : vector<8x16xf32> to vector<8x1xf32>
    %72 = vector.extract_strided_slice %54 {offsets = [2, 0], sizes = [1, 128], strides = [1, 1]} : vector<16x128xf32> to vector<1x128xf32>
    %73 = vector.broadcast %71 : vector<8x1xf32> to vector<8x128xf32>
    %74 = vector.broadcast %72 : vector<1x128xf32> to vector<8x128xf32>
    %75 = arith.mulf %73, %74 : vector<8x128xf32>
    %76 = arith.addf %70, %75 : vector<8x128xf32>
    %77 = vector.extract_strided_slice %55 {offsets = [0, 3], sizes = [8, 1], strides = [1, 1]} : vector<8x16xf32> to vector<8x1xf32>
    %78 = vector.extract_strided_slice %54 {offsets = [3, 0], sizes = [1, 128], strides = [1, 1]} : vector<16x128xf32> to vector<1x128xf32>
    %79 = vector.broadcast %77 : vector<8x1xf32> to vector<8x128xf32>
    %80 = vector.broadcast %78 : vector<1x128xf32> to vector<8x128xf32>
    %81 = arith.mulf %79, %80 : vector<8x128xf32>
    %82 = arith.addf %76, %81 : vector<8x128xf32>
    %83 = vector.extract_strided_slice %55 {offsets = [0, 4], sizes = [8, 1], strides = [1, 1]} : vector<8x16xf32> to vector<8x1xf32>
    %84 = vector.extract_strided_slice %54 {offsets = [4, 0], sizes = [1, 128], strides = [1, 1]} : vector<16x128xf32> to vector<1x128xf32>
    %85 = vector.broadcast %83 : vector<8x1xf32> to vector<8x128xf32>
    %86 = vector.broadcast %84 : vector<1x128xf32> to vector<8x128xf32>
    %87 = arith.mulf %85, %86 : vector<8x128xf32>
    %88 = arith.addf %82, %87 : vector<8x128xf32>
    %89 = vector.extract_strided_slice %55 {offsets = [0, 5], sizes = [8, 1], strides = [1, 1]} : vector<8x16xf32> to vector<8x1xf32>
    %90 = vector.extract_strided_slice %54 {offsets = [5, 0], sizes = [1, 128], strides = [1, 1]} : vector<16x128xf32> to vector<1x128xf32>
    %91 = vector.broadcast %89 : vector<8x1xf32> to vector<8x128xf32>
    %92 = vector.broadcast %90 : vector<1x128xf32> to vector<8x128xf32>
    %93 = arith.mulf %91, %92 : vector<8x128xf32>
    %94 = arith.addf %88, %93 : vector<8x128xf32>
    %95 = vector.extract_strided_slice %55 {offsets = [0, 6], sizes = [8, 1], strides = [1, 1]} : vector<8x16xf32> to vector<8x1xf32>
    %96 = vector.extract_strided_slice %54 {offsets = [6, 0], sizes = [1, 128], strides = [1, 1]} : vector<16x128xf32> to vector<1x128xf32>
    %97 = vector.broadcast %95 : vector<8x1xf32> to vector<8x128xf32>
    %98 = vector.broadcast %96 : vector<1x128xf32> to vector<8x128xf32>
    %99 = arith.mulf %97, %98 : vector<8x128xf32>
    %100 = arith.addf %94, %99 : vector<8x128xf32>
    %101 = vector.extract_strided_slice %55 {offsets = [0, 7], sizes = [8, 1], strides = [1, 1]} : vector<8x16xf32> to vector<8x1xf32>
    %102 = vector.extract_strided_slice %54 {offsets = [7, 0], sizes = [1, 128], strides = [1, 1]} : vector<16x128xf32> to vector<1x128xf32>
    %103 = vector.broadcast %101 : vector<8x1xf32> to vector<8x128xf32>
    %104 = vector.broadcast %102 : vector<1x128xf32> to vector<8x128xf32>
    %105 = arith.mulf %103, %104 : vector<8x128xf32>
    %106 = arith.addf %100, %105 : vector<8x128xf32>
    %107 = vector.extract_strided_slice %55 {offsets = [0, 8], sizes = [8, 1], strides = [1, 1]} : vector<8x16xf32> to vector<8x1xf32>
    %108 = vector.extract_strided_slice %54 {offsets = [8, 0], sizes = [1, 128], strides = [1, 1]} : vector<16x128xf32> to vector<1x128xf32>
    %109 = vector.broadcast %107 : vector<8x1xf32> to vector<8x128xf32>
    %110 = vector.broadcast %108 : vector<1x128xf32> to vector<8x128xf32>
    %111 = arith.mulf %109, %110 : vector<8x128xf32>
    %112 = arith.addf %106, %111 : vector<8x128xf32>
    %113 = vector.extract_strided_slice %55 {offsets = [0, 9], sizes = [8, 1], strides = [1, 1]} : vector<8x16xf32> to vector<8x1xf32>
    %114 = vector.extract_strided_slice %54 {offsets = [9, 0], sizes = [1, 128], strides = [1, 1]} : vector<16x128xf32> to vector<1x128xf32>
    %115 = vector.broadcast %113 : vector<8x1xf32> to vector<8x128xf32>
    %116 = vector.broadcast %114 : vector<1x128xf32> to vector<8x128xf32>
    %117 = arith.mulf %115, %116 : vector<8x128xf32>
    %118 = arith.addf %112, %117 : vector<8x128xf32>
    %119 = vector.extract_strided_slice %55 {offsets = [0, 10], sizes = [8, 1], strides = [1, 1]} : vector<8x16xf32> to vector<8x1xf32>
    %120 = vector.extract_strided_slice %54 {offsets = [10, 0], sizes = [1, 128], strides = [1, 1]} : vector<16x128xf32> to vector<1x128xf32>
    %121 = vector.broadcast %119 : vector<8x1xf32> to vector<8x128xf32>
    %122 = vector.broadcast %120 : vector<1x128xf32> to vector<8x128xf32>
    %123 = arith.mulf %121, %122 : vector<8x128xf32>
    %124 = arith.addf %118, %123 : vector<8x128xf32>
    %125 = vector.extract_strided_slice %55 {offsets = [0, 11], sizes = [8, 1], strides = [1, 1]} : vector<8x16xf32> to vector<8x1xf32>
    %126 = vector.extract_strided_slice %54 {offsets = [11, 0], sizes = [1, 128], strides = [1, 1]} : vector<16x128xf32> to vector<1x128xf32>
    %127 = vector.broadcast %125 : vector<8x1xf32> to vector<8x128xf32>
    %128 = vector.broadcast %126 : vector<1x128xf32> to vector<8x128xf32>
    %129 = arith.mulf %127, %128 : vector<8x128xf32>
    %130 = arith.addf %124, %129 : vector<8x128xf32>
    %131 = vector.extract_strided_slice %55 {offsets = [0, 12], sizes = [8, 1], strides = [1, 1]} : vector<8x16xf32> to vector<8x1xf32>
    %132 = vector.extract_strided_slice %54 {offsets = [12, 0], sizes = [1, 128], strides = [1, 1]} : vector<16x128xf32> to vector<1x128xf32>
    %133 = vector.broadcast %131 : vector<8x1xf32> to vector<8x128xf32>
    %134 = vector.broadcast %132 : vector<1x128xf32> to vector<8x128xf32>
    %135 = arith.mulf %133, %134 : vector<8x128xf32>
    %136 = arith.addf %130, %135 : vector<8x128xf32>
    %137 = vector.extract_strided_slice %55 {offsets = [0, 13], sizes = [8, 1], strides = [1, 1]} : vector<8x16xf32> to vector<8x1xf32>
    %138 = vector.extract_strided_slice %54 {offsets = [13, 0], sizes = [1, 128], strides = [1, 1]} : vector<16x128xf32> to vector<1x128xf32>
    %139 = vector.broadcast %137 : vector<8x1xf32> to vector<8x128xf32>
    %140 = vector.broadcast %138 : vector<1x128xf32> to vector<8x128xf32>
    %141 = arith.mulf %139, %140 : vector<8x128xf32>
    %142 = arith.addf %136, %141 : vector<8x128xf32>
    %143 = vector.extract_strided_slice %55 {offsets = [0, 14], sizes = [8, 1], strides = [1, 1]} : vector<8x16xf32> to vector<8x1xf32>
    %144 = vector.extract_strided_slice %54 {offsets = [14, 0], sizes = [1, 128], strides = [1, 1]} : vector<16x128xf32> to vector<1x128xf32>
    %145 = vector.broadcast %143 : vector<8x1xf32> to vector<8x128xf32>
    %146 = vector.broadcast %144 : vector<1x128xf32> to vector<8x128xf32>
    %147 = arith.mulf %145, %146 : vector<8x128xf32>
    %148 = arith.addf %142, %147 : vector<8x128xf32>
    %149 = vector.extract_strided_slice %55 {offsets = [0, 15], sizes = [8, 1], strides = [1, 1]} : vector<8x16xf32> to vector<8x1xf32>
    %150 = vector.extract_strided_slice %54 {offsets = [15, 0], sizes = [1, 128], strides = [1, 1]} : vector<16x128xf32> to vector<1x128xf32>
    %151 = vector.broadcast %149 : vector<8x1xf32> to vector<8x128xf32>
    %152 = vector.broadcast %150 : vector<1x128xf32> to vector<8x128xf32>
    %153 = arith.mulf %151, %152 : vector<8x128xf32>
    %154 = arith.addf %148, %153 : vector<8x128xf32>
    %cst_9 = arith.constant 0.000000e+00 : f32
    %155 = vector.broadcast %cst_9 : f32 to vector<8x128xf32>
    %156 = arith.maximumf %154, %155 : vector<8x128xf32>
    %c0_10 = arith.constant 0 : index
    %c0_11 = arith.constant 0 : index
    %157 = vector.load %arg6[%c0_10, %c0_11] : memref<1x8xf32, #tpu.memory_space<vmem>>, vector<1x8xf32>
    %c0_12 = arith.constant 0 : index
    %c0_13 = arith.constant 0 : index
    %158 = vector.load %arg7[%c0_12, %c0_13] : memref<1x1xf32, #tpu.memory_space<vmem>>, vector<1x1xf32>
    %159 = vector.shape_cast %158 : vector<1x1xf32> to vector<1x1xf32>
    %160 = vector.broadcast %159 : vector<1x1xf32> to vector<1x128xf32>
    %161 = vector.extract_strided_slice %157 {offsets = [0, 0], sizes = [1, 1], strides = [1, 1]} : vector<1x8xf32> to vector<1x1xf32>
    %162 = vector.extract_strided_slice %156 {offsets = [0, 0], sizes = [1, 128], strides = [1, 1]} : vector<8x128xf32> to vector<1x128xf32>
    %163 = vector.broadcast %161 : vector<1x1xf32> to vector<1x128xf32>
    %164 = arith.mulf %163, %162 : vector<1x128xf32>
    %165 = arith.addf %160, %164 : vector<1x128xf32>
    %166 = vector.extract_strided_slice %157 {offsets = [0, 1], sizes = [1, 1], strides = [1, 1]} : vector<1x8xf32> to vector<1x1xf32>
    %167 = vector.extract_strided_slice %156 {offsets = [1, 0], sizes = [1, 128], strides = [1, 1]} : vector<8x128xf32> to vector<1x128xf32>
    %168 = vector.broadcast %166 : vector<1x1xf32> to vector<1x128xf32>
    %169 = arith.mulf %168, %167 : vector<1x128xf32>
    %170 = arith.addf %165, %169 : vector<1x128xf32>
    %171 = vector.extract_strided_slice %157 {offsets = [0, 2], sizes = [1, 1], strides = [1, 1]} : vector<1x8xf32> to vector<1x1xf32>
    %172 = vector.extract_strided_slice %156 {offsets = [2, 0], sizes = [1, 128], strides = [1, 1]} : vector<8x128xf32> to vector<1x128xf32>
    %173 = vector.broadcast %171 : vector<1x1xf32> to vector<1x128xf32>
    %174 = arith.mulf %173, %172 : vector<1x128xf32>
    %175 = arith.addf %170, %174 : vector<1x128xf32>
    %176 = vector.extract_strided_slice %157 {offsets = [0, 3], sizes = [1, 1], strides = [1, 1]} : vector<1x8xf32> to vector<1x1xf32>
    %177 = vector.extract_strided_slice %156 {offsets = [3, 0], sizes = [1, 128], strides = [1, 1]} : vector<8x128xf32> to vector<1x128xf32>
    %178 = vector.broadcast %176 : vector<1x1xf32> to vector<1x128xf32>
    %179 = arith.mulf %178, %177 : vector<1x128xf32>
    %180 = arith.addf %175, %179 : vector<1x128xf32>
    %181 = vector.extract_strided_slice %157 {offsets = [0, 4], sizes = [1, 1], strides = [1, 1]} : vector<1x8xf32> to vector<1x1xf32>
    %182 = vector.extract_strided_slice %156 {offsets = [4, 0], sizes = [1, 128], strides = [1, 1]} : vector<8x128xf32> to vector<1x128xf32>
    %183 = vector.broadcast %181 : vector<1x1xf32> to vector<1x128xf32>
    %184 = arith.mulf %183, %182 : vector<1x128xf32>
    %185 = arith.addf %180, %184 : vector<1x128xf32>
    %186 = vector.extract_strided_slice %157 {offsets = [0, 5], sizes = [1, 1], strides = [1, 1]} : vector<1x8xf32> to vector<1x1xf32>
    %187 = vector.extract_strided_slice %156 {offsets = [5, 0], sizes = [1, 128], strides = [1, 1]} : vector<8x128xf32> to vector<1x128xf32>
    %188 = vector.broadcast %186 : vector<1x1xf32> to vector<1x128xf32>
    %189 = arith.mulf %188, %187 : vector<1x128xf32>
    %190 = arith.addf %185, %189 : vector<1x128xf32>
    %191 = vector.extract_strided_slice %157 {offsets = [0, 6], sizes = [1, 1], strides = [1, 1]} : vector<1x8xf32> to vector<1x1xf32>
    %192 = vector.extract_strided_slice %156 {offsets = [6, 0], sizes = [1, 128], strides = [1, 1]} : vector<8x128xf32> to vector<1x128xf32>
    %193 = vector.broadcast %191 : vector<1x1xf32> to vector<1x128xf32>
    %194 = arith.mulf %193, %192 : vector<1x128xf32>
    %195 = arith.addf %190, %194 : vector<1x128xf32>
    %196 = vector.extract_strided_slice %157 {offsets = [0, 7], sizes = [1, 1], strides = [1, 1]} : vector<1x8xf32> to vector<1x1xf32>
    %197 = vector.extract_strided_slice %156 {offsets = [7, 0], sizes = [1, 128], strides = [1, 1]} : vector<8x128xf32> to vector<1x128xf32>
    %198 = vector.broadcast %196 : vector<1x1xf32> to vector<1x128xf32>
    %199 = arith.mulf %198, %197 : vector<1x128xf32>
    %200 = arith.addf %195, %199 : vector<1x128xf32>
    %201 = arith.negf %200 : vector<1x128xf32>
    %202 = math.exp %201 : vector<1x128xf32>
    %cst_14 = arith.constant 1.000000e+00 : f32
    %203 = vector.broadcast %cst_14 : f32 to vector<1x128xf32>
    %204 = arith.addf %203, %202 : vector<1x128xf32>
    %205 = arith.divf %203, %204 : vector<1x128xf32>
    %c0_15 = arith.constant 0 : index
    %c0_16 = arith.constant 0 : index
    %206 = vector.load %arg8[%c0_15, %c0_16] : memref<1x128xf32, #tpu.memory_space<vmem>>, vector<1x128xf32>
    tpu.vector_store %arg8[%c0_15, %c0_16], %205 {strides = array<i32>} : memref<1x128xf32, #tpu.memory_space<vmem>>, vector<1x128xf32>,
    return
  }
  func.func @transform_0(%arg0: i32) -> (i32, i32) {
    %c0_i32 = arith.constant 0 : i32
    %c0_i32_0 = arith.constant 0 : i32
    return %c0_i32, %arg0 : i32, i32
  }
  func.func @transform_1(%arg0: i32) -> (i32, i32) {
    %c0_i32 = arith.constant 0 : i32
    %c0_i32_0 = arith.constant 0 : i32
    %c0_i32_1 = arith.constant 0 : i32
    return %c0_i32, %c0_i32_0 : i32, i32
  }
  func.func @transform_2(%arg0: i32) -> (i32, i32) {
    %c0_i32 = arith.constant 0 : i32
    %c0_i32_0 = arith.constant 0 : i32
    %c0_i32_1 = arith.constant 0 : i32
    return %c0_i32, %c0_i32_0 : i32, i32
  }
  func.func @transform_3(%arg0: i32) -> (i32, i32) {
    %c0_i32 = arith.constant 0 : i32
    %c0_i32_0 = arith.constant 0 : i32
    %c0_i32_1 = arith.constant 0 : i32
    return %c0_i32, %c0_i32_0 : i32, i32
  }
  func.func @transform_4(%arg0: i32) -> (i32, i32) {
    %c0_i32 = arith.constant 0 : i32
    %c0_i32_0 = arith.constant 0 : i32
    %c0_i32_1 = arith.constant 0 : i32
    return %c0_i32, %c0_i32_0 : i32, i32
  }
  func.func @transform_5(%arg0: i32) -> (i32, i32) {
    %c0_i32 = arith.constant 0 : i32
    %c0_i32_0 = arith.constant 0 : i32
    %c0_i32_1 = arith.constant 0 : i32
    return %c0_i32, %c0_i32_0 : i32, i32
  }
  func.func @transform_6(%arg0: i32) -> (i32, i32) {
    %c0_i32 = arith.constant 0 : i32
    %c0_i32_0 = arith.constant 0 : i32
    %c0_i32_1 = arith.constant 0 : i32
    return %c0_i32, %c0_i32_0 : i32, i32
  }
  func.func @transform_7(%arg0: i32) -> (i32, i32) {
    %c0_i32 = arith.constant 0 : i32
    %c0_i32_0 = arith.constant 0 : i32
    return %c0_i32, %arg0 : i32, i32
  }
}

</mosaic_0001>

<bundles_post_ra>
// kernel: tpu_custom_call.1
= control target key start
LH: loop header
LB: loop body
LE: loop exit
PB: predicated region body
PF: predicated region fallthrough
CT: control target
= control target key end

     0   :  { %s734_s0 = inlined_call_operand.vmem [shape: f32[8,128], index: 0, kind: input, shape index: {}]   ;;  %s735_s1 = inlined_call_operand.vmem [shape: f32[16,8], index: 1, kind: input, shape index: {}]   ;;  %s736_s2 = inlined_call_operand.vmem [shape: f32[16,1], index: 2, kind: input, shape index: {}]   ;;  %s737_s3 = inlined_call_operand.vmem [shape: f32[8,16], index: 3, kind: input, shape index: {}]   ;;  %s738_s4 = inlined_call_operand.vmem [shape: f32[8,1], index: 4, kind: input, shape index: {}]   ;;  %s739_s5 = inlined_call_operand.vmem [shape: f32[1,8], index: 5, kind: input, shape index: {}]   ;;  %s740_s6 = inlined_call_operand.<no memory space> [shape: f32[1,1], index: 6, kind: input, shape index: {}]   ;;  %s741_s7 = inlined_call_operand.hbm [shape: f32[1,128], index: 7, kind: output, shape index: {}]  }
   0x1   :  { %v12_v0 = vstv %s740_s6 }
   0x2   :  { %13 = vst [vmem:[#allocation2] sm:$0x1] %v12_v0 }
   0x3   :  { %v30_v1 = vld [vmem:[%s735_s1] sm:$0xff]  ;;  %v565_v2 = vmov 5   ;;  %v566_v3 = vmov 0   ;;  %v31_v4 = vld [vmem:[%s735_s1 + $0x8] sm:$0xff] }
   0x4   :  { %501 = vset.pattern.permute.xlu0 %v565_v2  ;;  %497 = vset.pattern.permute.xlu1 %v566_v3 }
   0x5   :  { %127 = vperm.xlu0 %501, %v30_v1   ;;  %46 = vperm.xlu1 %497, %v30_v1  }
   0x6   :  { %14 = vsyncpa [#allocation4], 0  ;;  %v567_v5 = vmov 3   ;;  %v568_v6 = vmov 1   ;;  %v32_v7 = vld [vmem:[%s736_s2] sm:$0xff]  ;;  %v33_v8 = vld [vmem:[%s736_s2 + $0x8] sm:$0xff]  ;;  %v54_v29 = vlaneseq }
   0x7   :  { %v569_v9 = vmov 4   ;;  %v570_v10 = vmov 6   ;;  %v177_v11 = vld [vmem:[%s738_s4] sm:$0xff]  ;;  %v571_v12 = vmov 7   ;;  %v572_v13 = vmov 2  }
   0x8   :  { %v176_v14 = vld [vmem:[%s737_s3] sm:$0xff]  ;;  %v573_v15 = vmov 9   ;;  %v574_v16 = vmov 12   ;;  %v575_v17 = vmov 15   ;;  %v576_v20 = vmov 8  }
   0x9   :  { %506 = vset.pattern.permute.xlu0 %v567_v5  ;;  %498 = vset.pattern.permute.xlu1 %v568_v6  ;;  %v346_v18 = vld [vmem:[#allocation2] sm:$0x1]  ;;  %v577_v21 = vmov 10   ;;  %v578_v22 = vmov 11   ;;  %v579_v23 = vmov 13   ;;  %v580_v24 = vmov 14  }
   0xa   :  { %99 = vperm.xlu0 %506, %v31_v4   ;;  %63 = vperm.xlu1 %498, %v30_v1   ;;  %v345_v19 = vld [vmem:[%s739_s5] sm:$0x1]  ;;  %v55_v32 = vshrl.u32 %v54_v29, 7 }
   0xb   :  { %v29_v36 = vld [vmem:[%s734_s0] sm:$0xff]  ;;  %s581_s0 = smov [#allocation3]  }
   0xc   :  { %v670_v35 = vsub.s32 0, %v55_v32  ;;  %v676_v39 = vsub.s32 1, %v55_v32  ;;  %v678_v41 = vsub.s32 2, %v55_v32  ;;  %v682_v47 = vsub.s32 3, %v55_v32  ;;  %s471_s13 = sshll.u32 %s581_s0, 4  ;;  %s472_s13 = int_to_ptr.vmem [resolvable:$true] %s471_s13 }
   0xd   :  { %v685_v54 = vsub.s32 4, %v55_v32  ;;  %v687_v56 = vsub.s32 5, %v55_v32  ;;  %v691_v0 = vsub.s32 6, %v55_v32  ;;  %s541_s14 = scalar_lea.vmem %s472_s13, 16  ;;  %s545_s15 = scalar_lea.vmem %s472_s13, 32 }
   0xe   :  { %507 = vset.pattern.permute.xlu0 %v566_v3  ;;  %499 = vset.pattern.permute.xlu1 %v567_v5  ;;  %v57_v38 = vrot.slane %v29_v36, %v670_v35  ;;  %v73_v44 = vrot.slane %v29_v36, %v676_v39  ;;  %v89_v45 = vrot.slane %v29_v36, %v678_v41  ;;  %p542_p0 = scmp.ne.s32.totalorder %s472_s13, %s541_s14  ;;  %p546_p1 = scmp.lt.s32.totalorder %s472_s13, %s472_s13 }
   0xf   :  { %36 = vperm.xlu0 %507, %v32_v7   ;;  %95 = vperm.xlu1 %499, %v30_v1   ;;  %v105_v52 = vrot.slane %v29_v36, %v682_v47  ;;  %v121_v59 = vrot.slane %v29_v36, %v685_v54  ;;  %v137_v61 = vrot.slane %v29_v36, %v687_v56  ;;  %p547_p2 = scmp.lt.s32.totalorder %s545_s15, %s541_s14 }
  0x11   :  { %p548_p3 = por %p547_p2, %p546_p1 }
  0x13   :  { %41 = vperm.xlu0 %507, %v33_v8   ;;  %500 = vset.pattern.permute.xlu1 %v569_v9  ;;  %p549_p4 = pnand %p548_p3, %p542_p0 }
  0x14   :  { %111 = vperm.xlu1 %500, %v30_v1  }
  0x17   :  { %51 = vperm.xlu0 %507, %v31_v4  }
  0x18   :  { %502 = vset.pattern.permute.xlu1 %v570_v10 }
  0x19   :  { %143 = vperm.xlu1 %502, %v30_v1  }
  0x1b   :  { %180 = vperm.xlu0 %507, %v177_v11  }
  0x1d   :  { %503 = vset.pattern.permute.xlu1 %v571_v12 }
  0x1e   :  { %159 = vperm.xlu1 %503, %v30_v1  }
  0x1f   :  { %510 = vset.pattern.permute.xlu0 %v572_v13 }
  0x20   :  { %79 = vperm.xlu0 %510, %v30_v1  }
  0x22   :  { %504 = vset.pattern.permute.xlu1 %v568_v6 }
  0x23   :  { %67 = vperm.xlu1 %504, %v31_v4  }
  0x24   :  { %205 = vperm.xlu0 %510, %v176_v14  }
  0x27   :  { %505 = vset.pattern.permute.xlu1 %v572_v13 }
  0x28   :  { %83 = vperm.xlu1 %505, %v31_v4   ;;  %515 = vset.pattern.permute.xlu0 %v571_v12 }
  0x29   :  { %163 = vperm.xlu0 %515, %v31_v4  }
  0x2c   :  { %508 = vset.pattern.permute.xlu1 %v566_v3 }
  0x2d   :  { %185 = vperm.xlu1 %508, %v176_v14   ;;  %518 = vset.pattern.permute.xlu0 %v570_v10 }
  0x2e   :  { %245 = vperm.xlu0 %518, %v176_v14  }
  0x31   :  { %509 = vset.pattern.permute.xlu1 %v569_v9 }
  0x32   :  { %115 = vperm.xlu1 %509, %v31_v4   ;;  %521 = vset.pattern.permute.xlu0 %v573_v15 }
  0x33   :  { %275 = vperm.xlu0 %521, %v176_v14  }
  0x36   :  { %511 = vset.pattern.permute.xlu1 %v568_v6 }
  0x37   :  { %195 = vperm.xlu1 %511, %v176_v14   ;;  %524 = vset.pattern.permute.xlu0 %v574_v16 }
  0x38   :  { %305 = vperm.xlu0 %524, %v176_v14  }
  0x3b   :  { %512 = vset.pattern.permute.xlu1 %v565_v2 }
  0x3c   :  { %131 = vperm.xlu1 %512, %v31_v4   ;;  %527 = vset.pattern.permute.xlu0 %v575_v17 }
  0x3d   :  { %335 = vperm.xlu0 %527, %v176_v14  }
  0x40   :  { %513 = vset.pattern.permute.xlu1 %v570_v10 }
  0x41   :  { %147 = vperm.xlu1 %513, %v31_v4   ;;  %530 = vset.pattern.permute.xlu0 %v566_v3  ;;  %v153_v4 = vrot.slane %v29_v36, %v691_v0 }
  0x42   :  { %349 = vperm.xlu0 %530, %v346_v18  }
  0x45   :  { %514 = vset.pattern.permute.xlu1 %v567_v5 }
  0x46   :  { %215 = vperm.xlu1 %514, %v176_v14   ;;  %533 = vset.pattern.permute.xlu0 %v569_v9 }
  0x47   :  { %407 = vperm.xlu0 %533, %v345_v19  }
  0x4a   :  { %516 = vset.pattern.permute.xlu1 %v569_v9 }
  0x4b   :  { %225 = vperm.xlu1 %516, %v176_v14   ;;  %536 = vset.pattern.permute.xlu0 %v571_v12 }
  0x4c   :  { %446 = vperm.xlu0 %536, %v345_v19  }
  0x4f   :  { %517 = vset.pattern.permute.xlu1 %v565_v2 }
  0x50   :  { %235 = vperm.xlu1 %517, %v176_v14  }
  0x54   :  { %519 = vset.pattern.permute.xlu1 %v571_v12 }
  0x55   :  { %255 = vperm.xlu1 %519, %v176_v14  }
  0x59   :  { %520 = vset.pattern.permute.xlu1 %v576_v20 }
  0x5a   :  { %265 = vperm.xlu1 %520, %v176_v14  }
  0x5e   :  { %522 = vset.pattern.permute.xlu1 %v577_v21 }
  0x5f   :  { %285 = vperm.xlu1 %522, %v176_v14  }
  0x63   :  { %523 = vset.pattern.permute.xlu1 %v578_v22 }
  0x64   :  { %295 = vperm.xlu1 %523, %v176_v14  }
  0x68   :  { %525 = vset.pattern.permute.xlu1 %v579_v23 }
  0x69   :  { %315 = vperm.xlu1 %525, %v176_v14  }
  0x6d   :  { %526 = vset.pattern.permute.xlu1 %v580_v24 }
  0x6e   :  { %325 = vperm.xlu1 %526, %v176_v14  }
  0x72   :  { %528 = vset.pattern.permute.xlu1 %v566_v3 }
  0x73   :  { %358 = vperm.xlu1 %528, %v345_v19  }
  0x77   :  { %529 = vset.pattern.permute.xlu1 %v568_v6 }
  0x78   :  { %368 = vperm.xlu1 %529, %v345_v19  }
  0x7c   :  { %531 = vset.pattern.permute.xlu1 %v572_v13 }
  0x7d   :  { %381 = vperm.xlu1 %531, %v345_v19  }
  0x81   :  { %532 = vset.pattern.permute.xlu1 %v567_v5  ;;  %v694_v5 = vsub.s32 7, %v55_v32 }
  0x82   :  { %394 = vperm.xlu1 %532, %v345_v19  }
  0x83   :  { %v169_v9 = vrot.slane %v29_v36, %v694_v5 }
  0x84   :  { %v47_v25 = vpop.permute.xlu1 %46  ;;  %v128_v26 = vpop.permute.xlu0 %127 }
  0x85   :  { %v58_v43 = vmul.f32 %v57_v38, %v47_v25  ;;  %v138_v1 = vmul.f32 %v137_v61, %v128_v26 }
  0x86   :  { %534 = vset.pattern.permute.xlu1 %v565_v2 }
  0x87   :  { %420 = vperm.xlu1 %534, %v345_v19  }
  0x89   :  { %v64_v27 = vpop.permute.xlu1 %63  ;;  %v100_v28 = vpop.permute.xlu0 %99 }
  0x8a   :  { %v74_v50 = vmul.f32 %v73_v44, %v64_v27  ;;  %v107_v23 = vmul.f32 %v105_v52, %v100_v28 }
  0x8b   :  { %535 = vset.pattern.permute.xlu1 %v570_v10 }
  0x8c   :  { %433 = vperm.xlu1 %535, %v345_v19  }
  0x8e   :  { %v37_v30 = vpop.permute.xlu0 %36  ;;  %v96_v31 = vpop.permute.xlu1 %95 }
  0x8f   :  { %v60_v48 = vadd.f32 %v58_v43, %v37_v30  ;;  %v106_v58 = vmul.f32 %v105_v52, %v96_v31 }
  0x91   :  { %v76_v53 = vadd.f32 %v74_v50, %v60_v48 }
  0x92   :  { %v42_v33 = vpop.permute.xlu0 %41 }
  0x93   :  { %v112_v34 = vpop.permute.xlu1 %111 }
  0x94   :  { %v122_v63 = vmul.f32 %v121_v59, %v112_v34 }
  0x96   :  { %v52_v37 = vpop.permute.xlu0 %51 }
  0x97   :  { %v59_v13 = vmul.f32 %v57_v38, %v52_v37 }
  0x98   :  { %v144_v40 = vpop.permute.xlu1 %143 }
  0x99   :  { %v154_v8 = vmul.f32 %v153_v4, %v144_v40  ;;  %v61_v16 = vadd.f32 %v59_v13, %v42_v33 }
  0x9a   :  { %v181_v42 = vpop.permute.xlu0 %180 }
  0x9d   :  { %v160_v46 = vpop.permute.xlu1 %159 }
  0x9e   :  { %v170_v11 = vmul.f32 %v169_v9, %v160_v46 }
  0x9f   :  { %v80_v49 = vpop.permute.xlu0 %79 }
  0xa0   :  { %v90_v51 = vmul.f32 %v89_v45, %v80_v49 }
  0xa2   :  { %v68_v55 = vpop.permute.xlu1 %67  ;;  %v92_v57 = vadd.f32 %v90_v51, %v76_v53 }
  0xa3   :  { %v75_v18 = vmul.f32 %v73_v44, %v68_v55  ;;  %v206_v25 = vpop.permute.xlu0 %205 }
  0xa4   :  { %v108_v62 = vadd.f32 %v106_v58, %v92_v57 }
  0xa5   :  { %v77_v20 = vadd.f32 %v75_v18, %v61_v16 }
  0xa6   :  { %v124_v2 = vadd.f32 %v122_v63, %v108_v62 }
  0xa7   :  { %v84_v60 = vpop.permute.xlu1 %83 }
  0xa8   :  { %v140_v6 = vadd.f32 %v138_v1, %v124_v2  ;;  %v91_v19 = vmul.f32 %v89_v45, %v84_v60  ;;  %v164_v40 = vpop.permute.xlu0 %163 }
  0xa9   :  { %v171_v46 = vmul.f32 %v169_v9, %v164_v40 }
  0xaa   :  { %v156_v10 = vadd.f32 %v154_v8, %v140_v6  ;;  %v93_v24 = vadd.f32 %v91_v19, %v77_v20 }
  0xac   :  { %v186_v3 = vpop.permute.xlu1 %185  ;;  %v172_v14 = vadd.f32 %v170_v11, %v156_v10  ;;  %v109_v31 = vadd.f32 %v107_v23, %v93_v24 }
  0xad   :  { %v246_v62 = vpop.permute.xlu0 %245 }
  0xae   :  { %v174_v17 = vmax.f32 %v172_v14, 0.0 }
  0xb0   :  { %v191_v21 = vrot.slane %v174_v17, %v670_v35  ;;  %v201_v29 = vrot.slane %v174_v17, %v676_v39  ;;  %v211_v33 = vrot.slane %v174_v17, %v678_v41  ;;  %v221_v28 = vrot.slane %v174_v17, %v682_v47 }
  0xb1   :  { %v116_v7 = vpop.permute.xlu1 %115  ;;  %v231_v51 = vrot.slane %v174_v17, %v685_v54  ;;  %v241_v55 = vrot.slane %v174_v17, %v687_v56  ;;  %v251_v60 = vrot.slane %v174_v17, %v691_v0 }
  0xb2   :  { %v192_v26 = vmul.f32 %v191_v21, %v186_v3  ;;  %v123_v27 = vmul.f32 %v121_v59, %v116_v7  ;;  %v212_v48 = vmul.f32 %v211_v33, %v206_v25 }
  0xb3   :  { %v252_v3 = vmul.f32 %v251_v60, %v246_v62 }
  0xb4   :  { %v193_v36 = vadd.f32 %v192_v26, %v181_v42  ;;  %v125_v37 = vadd.f32 %v123_v27, %v109_v31 }
  0xb6   :  { %v196_v12 = vpop.permute.xlu1 %195 }
  0xb7   :  { %v202_v32 = vmul.f32 %v201_v29, %v196_v12 }
  0xb9   :  { %v203_v43 = vadd.f32 %v202_v32, %v193_v36 }
  0xbb   :  { %v132_v15 = vpop.permute.xlu1 %131  ;;  %v213_v52 = vadd.f32 %v212_v48, %v203_v43 }
  0xbc   :  { %v139_v34 = vmul.f32 %v137_v61, %v132_v15  ;;  %v276_v15 = vpop.permute.xlu0 %275 }
  0xbe   :  { %v141_v44 = vadd.f32 %v139_v34, %v125_v37 }
  0xc0   :  { %v148_v22 = vpop.permute.xlu1 %147  ;;  %v306_v27 = vpop.permute.xlu0 %305 }
  0xc1   :  { %v155_v38 = vmul.f32 %v153_v4, %v148_v22  ;;  %v261_v4 = vrot.slane %v174_v17, %v694_v5 }
  0xc3   :  { %v157_v49 = vadd.f32 %v155_v38, %v141_v44 }
  0xc4   :  { %v336_v36 = vpop.permute.xlu0 %335 }
  0xc5   :  { %v216_v30 = vpop.permute.xlu1 %215  ;;  %v173_v42 = vadd.f32 %v171_v46, %v157_v49 }
  0xc6   :  { %v222_v50 = vmul.f32 %v221_v28, %v216_v30 }
  0xc7   :  { %v175_v63 = vmax.f32 %v173_v42, 0.0 }
  0xc8   :  { %v223_v58 = vadd.f32 %v222_v50, %v213_v52 }
  0xc9   :  { %v271_v8 = vrot.slane %v175_v63, %v670_v35  ;;  %v281_v11 = vrot.slane %v175_v63, %v676_v39  ;;  %v291_v18 = vrot.slane %v175_v63, %v678_v41  ;;  %v301_v21 = vrot.slane %v175_v63, %v682_v47 }
  0xca   :  { %v226_v45 = vpop.permute.xlu1 %225  ;;  %v311_v23 = vrot.slane %v175_v63, %v685_v54  ;;  %v321_v29 = vrot.slane %v175_v63, %v687_v56  ;;  %v331_v32 = vrot.slane %v175_v63, %v691_v0  ;;  %v341_v33 = vrot.slane %v175_v63, %v694_v5 }
  0xcb   :  { %v232_v53 = vmul.f32 %v231_v51, %v226_v45  ;;  %v282_v16 = vmul.f32 %v281_v11, %v276_v15  ;;  %v350_v45 = vpop.permute.xlu0 %349 }
  0xcc   :  { %v312_v39 = vmul.f32 %v311_v23, %v306_v27  ;;  %v342_v54 = vmul.f32 %v341_v33, %v336_v36  ;;  %v355_v49 = vrot.slane %v350_v45, %v670_v35 }
  0xcd   :  { %v233_v61 = vadd.f32 %v232_v53, %v223_v58 }
  0xcf   :  { %v236_v57 = vpop.permute.xlu1 %235  ;;  %v408_v52 = vpop.permute.xlu0 %407 }
  0xd0   :  { %v242_v59 = vmul.f32 %v241_v55, %v236_v57  ;;  %v413_v55 = vrot.slane %v408_v52, %v670_v35 }
  0xd2   :  { %v243_v1 = vadd.f32 %v242_v59, %v233_v61 }
  0xd4   :  { %v256_v2 = vpop.permute.xlu1 %255  ;;  %v253_v6 = vadd.f32 %v252_v3, %v243_v1 }
  0xd5   :  { %v262_v7 = vmul.f32 %v261_v4, %v256_v2  ;;  %v447_v2 = vpop.permute.xlu0 %446 }
  0xd7   :  { %v263_v12 = vadd.f32 %v262_v7, %v253_v6 }
  0xd9   :  { %v266_v9 = vpop.permute.xlu1 %265 }
  0xda   :  { %v272_v10 = vmul.f32 %v271_v8, %v266_v9  ;;  %v452_v8 = vrot.slane %v447_v2, %v670_v35 }
  0xdc   :  { %v273_v13 = vadd.f32 %v272_v10, %v263_v12 }
  0xde   :  { %v286_v14 = vpop.permute.xlu1 %285  ;;  %v283_v19 = vadd.f32 %v282_v16, %v273_v13 }
  0xdf   :  { %v292_v20 = vmul.f32 %v291_v18, %v286_v14 }
  0xe1   :  { %v293_v24 = vadd.f32 %v292_v20, %v283_v19 }
  0xe3   :  { %v296_v17 = vpop.permute.xlu1 %295 }
  0xe4   :  { %v302_v22 = vmul.f32 %v301_v21, %v296_v17 }
  0xe6   :  { %v303_v25 = vadd.f32 %v302_v22, %v293_v24 }
  0xe8   :  { %v316_v26 = vpop.permute.xlu1 %315  ;;  %v313_v30 = vadd.f32 %v312_v39, %v303_v25 }
  0xe9   :  { %v322_v31 = vmul.f32 %v321_v29, %v316_v26 }
  0xeb   :  { %v323_v47 = vadd.f32 %v322_v31, %v313_v30 }
  0xed   :  { %v326_v41 = vpop.permute.xlu1 %325 }
  0xee   :  { %v332_v34 = vmul.f32 %v331_v32, %v326_v41 }
  0xf0   :  { %v333_v37 = vadd.f32 %v332_v34, %v323_v47 }
  0xf2   :  { %v359_v38 = vpop.permute.xlu1 %358  ;;  %v343_v40 = vadd.f32 %v342_v54, %v333_v37 }
  0xf3   :  { %v364_v56 = vrot.slane %v359_v38, %v670_v35 }
  0xf4   :  { %v344_v28 = vmax.f32 %v343_v40, 0.0 }
  0xf6   :  { %v365_v5 = vmul.f32 %v364_v56, %v344_v28  ;;  %v414_v61 = vmul.f32 %v413_v55, %v344_v28  ;;  %v453_v13 = vmul.f32 %v452_v8, %v344_v28 }
  0xf7   :  { %v369_v43 = vpop.permute.xlu1 %368 }
  0xf8   :  { %v374_v44 = vrot.slane %v369_v43, %v670_v35  ;;  %v366_v57 = vadd.f32 %v365_v5, %v355_v49  ;;  %v416_v7 = vrot.slane %v414_v61, 4  ;;  %v455_v18 = vrot.slane %v453_v13, 7 }
  0xfa   :  { %v375_v46 = vmul.f32 %v374_v44, %v344_v28 }
  0xfc   :  { %v382_v48 = vpop.permute.xlu1 %381  ;;  %v377_v51 = vrot.slane %v375_v46, 1 }
  0xfd   :  { %v387_v0 = vrot.slane %v382_v48, %v670_v35 }
  0xfe   :  { %v379_v59 = vadd.f32 %v377_v51, %v366_v57 }
  0xff   :  { %v388_v50 = vmul.f32 %v387_v0, %v344_v28 }
 0x101   :  { %v395_v53 = vpop.permute.xlu1 %394  ;;  %v390_v42 = vrot.slane %v388_v50, 2 }
 0x102   :  { %v400_v58 = vrot.slane %v395_v53, %v670_v35 }
 0x103   :  { %v392_v62 = vadd.f32 %v390_v42, %v379_v59 }
 0x104   :  { %v401_v60 = vmul.f32 %v400_v58, %v344_v28 }
 0x106   :  { %v403_v63 = vrot.slane %v401_v60, 3  ;;  %v421_v1 = vpop.permute.xlu1 %420 }
 0x107   :  { %v426_v3 = vrot.slane %v421_v1, %v670_v35 }
 0x108   :  { %v405_v4 = vadd.f32 %v403_v63, %v392_v62 }
 0x109   :  { %v427_v6 = vmul.f32 %v426_v3, %v344_v28 }
 0x10a   :  { %v418_v10 = vadd.f32 %v416_v7, %v405_v4 }
 0x10b   :  { %v434_v9 = vpop.permute.xlu1 %433  ;;  %v429_v11 = vrot.slane %v427_v6, 5 }
 0x10c   :  { %v439_v12 = vrot.slane %v434_v9, %v670_v35 }
 0x10d   :  { %v431_v15 = vadd.f32 %v429_v11, %v418_v10 }
 0x10e   :  { %v440_v14 = vmul.f32 %v439_v12, %v344_v28 }
 0x110   :  { %v442_v16 = vrot.slane %v440_v14, 6 }
 0x112   :  { %v444_v19 = vadd.f32 %v442_v16, %v431_v15 }
 0x114   :  { %v457_v20 = vadd.f32 %v455_v18, %v444_v19 }
 0x116   :  { %v479_v21 = vmul.f32 -1.442695, %v457_v20 }
 0x118   :  { %537 = vpow2.f32 %v479_v21 }
 0x122   :  { %v538_v17 = vpop.eup %537 }
 0x123   :  { %v461_v22 = vadd.f32 1.0, %v538_v17 }
 0x125   :  { %539 = vrcp.f32 %v461_v22 }
 0x12f   :  { %v540_v23 = vpop.eup %539 }
 0x130   :  { %464 = vst [vmem:[#allocation3] sm:$0x1] %v540_v23 }
 0x131   :  { %552 = shalt.err (!%p549_p4)
}
 0x132   :  { %s553_s18 = scalar_lea.hbm %s741_s7, 16 }
 0x133   :  { %p554_p5 = scmp.ne.s32.totalorder %s741_s7, %s553_s18  ;;  %p557_p6 = scmp.lt.u32.totalorder %s553_s18, %s741_s7 }
 0x135   :  { %p559_p7 = pnand %p557_p6, %p554_p5 }
 0x137   :  { %562 = shalt.err (!%p559_p7)
}
 0x138   :  { %474 = dma.vmem_to_hbm [thread:$0]  %s472_s13, 16, %s741_s7, [#allocation4]  }
 0x139   :  { %563 = dma.done.wait [#allocation4], 16  }
 0x13a   :  { %564 = vsyncadd [#allocation4], 4294967280 }
 0x13b   :  { %478 = vsyncpa [#allocation4], 1 }

</bundles_post_ra>
